<compile_context>
chip_gen: v6e
topology: v6e:2x2x1
jax: 0.10.0
libtpu: 0.0.40
codegen_flags: <defaults>
</compile_context>

<pallas_src>
import math
import numpy as np
import jax
import jax.numpy as jnp
from jax.experimental import pallas as pl
from jax.experimental.pallas import tpu as pltpu

# ----------------------------- problem sizes --------------------------------
N_NODES = 8
N_EDGES = 16
E_BLK   = N_EDGES      # single grid step: whole edge set in one block

MUL     = 4            # multiplicity of node-feature irreps
X_DIM   = 16           # 4x0e + 4x1o
SH_DIM  = 4            # 1x0e + 1x1o
D_EMB   = 8            # edge embedding dim (weight_layer_input_to_hidden[0])
HIDDEN  = 16           # hidden dim of weight MLP
W_NUMEL = 16           # TensorProduct.weight_numel (4 instructions x 4 weights)
OUT_DIM = 32           # irreps_mid dim
N_TERMS = 40           # uvu product terms before CG reduction (4 + 12 + 12 + 12)

LN2       = math.log(2.0)
INV_SQRT3 = 1.0 / math.sqrt(3.0)


def _ssp_norm_const():
    # e3nn normalize2mom constant for ShiftedSoftPlus: 1/sqrt(E[(softplus(z)-ln2)^2]),
    # z ~ N(0,1). Computed deterministically with Gauss-Hermite quadrature.
    xs, ws = np.polynomial.hermite.hermgauss(200)
    z = np.sqrt(2.0) * xs
    f = np.logaddexp(z, 0.0) - LN2
    second_moment = np.sum(ws * f * f) / np.sqrt(np.pi)
    return float(1.0 / np.sqrt(second_moment))


SSP_NORM = _ssp_norm_const()


def _build_tp_tables():
    """Trace-time constant matrices for the specialized uvu TensorProduct.

    term t uses x column xi(t), filter column si(t), weight column wi(t); the 40-wide
    elementwise product xe*se*we is mapped to the 32-wide irreps_mid message by R
    (identity for single-term outputs, 1/sqrt(3)-weighted sum for the 1o x 1o -> 0e CG
    contraction).
    """
    gx  = np.zeros((X_DIM,   N_TERMS), np.float32)
    gs  = np.zeros((SH_DIM,  N_TERMS), np.float32)
    gw  = np.zeros((W_NUMEL, N_TERMS), np.float32)
    red = np.zeros((N_TERMS, OUT_DIM), np.float32)
    t = 0
    # inst1: 0e x 0e -> 0e  (out cols 0:4)
    for u in range(MUL):
        gx[u, t] = 1.0; gs[0, t] = 1.0; gw[u, t] = 1.0
        red[t, u] = 1.0
        t += 1
    # inst4: 1o x 1o -> 0e  (out cols 4:8, CG contraction sum_k / sqrt(3))
    for u in range(MUL):
        for k in range(3):
            gx[4 + 3 * u + k, t] = 1.0; gs[1 + k, t] = 1.0; gw[12 + u, t] = 1.0
            red[t, 4 + u] = INV_SQRT3
            t += 1
    # inst2: 0e x 1o -> 1o  (out cols 8:20)
    for u in range(MUL):
        for k in range(3):
            gx[u, t] = 1.0; gs[1 + k, t] = 1.0; gw[4 + u, t] = 1.0
            red[t, 8 + 3 * u + k] = 1.0
            t += 1
    # inst3: 1o x 0e -> 1o  (out cols 20:32)
    for u in range(MUL):
        for k in range(3):
            gx[4 + 3 * u + k, t] = 1.0; gs[0, t] = 1.0; gw[8 + u, t] = 1.0
            red[t, 20 + 3 * u + k] = 1.0
            t += 1
    assert t == N_TERMS
    return jnp.asarray(gx), jnp.asarray(gs), jnp.asarray(gw), jnp.asarray(red)


GX_CONST, GS_CONST, GW_CONST, RED_CONST = _build_tp_tables()


# ------------------------------- Pallas kernel -------------------------------
def irreps_conv_kernel(dst_ref, src_ref, x_ref, sh_ref, emb_ref, w1_ref, w2_ref,
                       gx_ref, gs_ref, gw_ref, red_ref, denom_ref, out_ref):
    # ---- per-edge weight MLP (FullyConnectedNet [D_EMB, HIDDEN, W_NUMEL], ShiftedSoftPlus)
    #      constant scalings folded into the small resident weight tiles (one-time).
    w1s = w1_ref[...] * (1.0 / math.sqrt(D_EMB))                          # (8,16)
    w2s = w2_ref[...] * (SSP_NORM / math.sqrt(HIDDEN))                    # (16,16)
    h = jnp.dot(emb_ref[...], w1s, preferred_element_type=jnp.float32)    # (E,16)
    sp = jnp.maximum(h, 0.0) + jnp.log1p(jnp.exp(-jnp.abs(h)))            # stable softplus
    w = jnp.dot(sp - LN2, w2s, preferred_element_type=jnp.float32)        # (E,16) per-edge TP weights

    # ---- in-kernel source gather: x[src] @ Gx == onehot_src @ (x @ Gx) ----
    xg = jnp.dot(x_ref[...], gx_ref[...], preferred_element_type=jnp.float32)   # (N,40)
    iota_en = jax.lax.broadcasted_iota(jnp.int32, (E_BLK, N_NODES), 1)
    onehot_src = (iota_en == src_ref[...]).astype(jnp.float32)                  # (E,N)
    xe = jnp.dot(onehot_src, xg, preferred_element_type=jnp.float32)            # (E,40)

    # ---- uvu TensorProduct: constant expansions + one full-width elementwise product ----
    se = jnp.dot(sh_ref[...], gs_ref[...], preferred_element_type=jnp.float32)  # (E,40)
    we = jnp.dot(w, gw_ref[...], preferred_element_type=jnp.float32)            # (E,40)
    prod = xe * se * we                                                          # (E,40) VPU

    # ---- scatter-add to dst nodes; 1/denominator folded into the one-hot build ----
    inv_denom = 1.0 / denom_ref[...]                                             # (1,1) one-time
    iota_ne = jax.lax.broadcasted_iota(jnp.int32, (N_NODES, E_BLK), 0)
    onehot_dst = jnp.where(iota_ne == dst_ref[...], inv_denom, 0.0)              # (N,E)
    scattered = jnp.dot(onehot_dst, prod, preferred_element_type=jnp.float32)    # (N,40)

    # ---- constant CG reduction (inst4 triples summed with 1/sqrt(3)), fused after scatter ----
    out_ref[...] = jnp.dot(scattered, red_ref[...], preferred_element_type=jnp.float32)  # (N,32)


# ------------------------------- wrapper --------------------------------------
def irreps_convolution(x, edge_attr, edge_embed, edge_index, w1, w2, denom):
    edge_dst = edge_index[0].astype(jnp.int32).reshape(1, N_EDGES)   # (1,E) row  (scatter one-hot)
    edge_src = edge_index[1].astype(jnp.int32).reshape(N_EDGES, 1)   # (E,1) col  (gather one-hot)
    denom2d = denom.reshape(1, 1)

    def full_spec(shape):
        return pl.BlockSpec(shape, lambda i: (0,) * len(shape))

    return pl.pallas_call(
        irreps_conv_kernel,
        out_shape=jax.ShapeDtypeStruct((N_NODES, OUT_DIM), jnp.float32),
        grid_spec=pltpu.PrefetchScalarGridSpec(
            num_scalar_prefetch=0,
            grid=(1,),                                   # single step: no accumulator carry
            in_specs=[
                full_spec((1, N_EDGES)),                 # edge_dst (row vector)
                full_spec((N_EDGES, 1)),                 # edge_src (column vector)
                full_spec((N_NODES, X_DIM)),             # full node-feature table (gather in kernel)
                full_spec((N_EDGES, SH_DIM)),            # edge_attr (filter / sph. harmonics)
                full_spec((N_EDGES, D_EMB)),             # edge embedding
                full_spec((D_EMB, HIDDEN)),              # MLP W1
                full_spec((HIDDEN, W_NUMEL)),            # MLP W2
                full_spec((X_DIM, N_TERMS)),             # Gx  (constant expansion)
                full_spec((SH_DIM, N_TERMS)),            # Gs  (constant expansion)
                full_spec((W_NUMEL, N_TERMS)),           # Gw  (constant expansion)
                full_spec((N_TERMS, OUT_DIM)),           # R   (constant CG reduction)
                full_spec((1, 1)),                       # denominator
            ],
            out_specs=full_spec((N_NODES, OUT_DIM)),
        ),
        compiler_params=pltpu.CompilerParams(dimension_semantics=("arbitrary",)),
    )(edge_dst, edge_src, x, edge_attr, edge_embed, w1, w2,
      GX_CONST, GS_CONST, GW_CONST, RED_CONST, denom2d)


# --------------------------- pure-JAX reference --------------------------------
def reference(x, edge_attr, edge_embed, edge_index, w1, w2, denom):
    edge_src = edge_index[1]
    edge_dst = edge_index[0]
    h = edge_embed @ w1 / math.sqrt(D_EMB)
    h = SSP_NORM * (jax.nn.softplus(h) - LN2)
    w = h @ w2 / math.sqrt(HIDDEN)
    xs = x[edge_src]
    x0 = xs[:, 0:4]
    xv = xs[:, 4:16].reshape(-1, MUL, 3)
    s0 = edge_attr[:, 0:1]
    sv = edge_attr[:, 1:4]
    wA, wB, wC, wD = w[:, 0:4], w[:, 4:8], w[:, 8:12], w[:, 12:16]
    m0 = wA * x0 * s0
    m1 = wD * INV_SQRT3 * jnp.sum(xv * sv[:, None, :], axis=2)
    m2 = (wB[:, :, None] * x0[:, :, None] * sv[:, None, :]).reshape(-1, 12)
    m3 = (wC[:, :, None] * xv * s0[:, :, None]).reshape(-1, 12)
    msg = jnp.concatenate([m0, m1, m2, m3], axis=1)
    out = jax.ops.segment_sum(msg, edge_dst, num_segments=N_NODES)
    return out / denom[0]


# ------------------------------------ main -------------------------------------
if __name__ == "__main__":
    key = jax.random.PRNGKey(0)
    k_x, k_sh, k_emb, k_ei, k_w1, k_w2 = jax.random.split(key, 6)

    x = jax.random.normal(k_x, (N_NODES, X_DIM), dtype=jnp.float32)             # node features
    edge_attr = jax.random.normal(k_sh, (N_EDGES, SH_DIM), dtype=jnp.float32)   # filter / sph. harmonics
    edge_embed = jax.random.normal(k_emb, (N_EDGES, D_EMB), dtype=jnp.float32)  # edge embedding
    edge_index = jax.random.randint(k_ei, (2, N_EDGES), 0, N_NODES, dtype=jnp.int32)

    # FullyConnectedNet parameters (e3nn init: standard normal)
    w1 = jax.random.normal(k_w1, (D_EMB, HIDDEN), dtype=jnp.float32)
    w2 = jax.random.normal(k_w2, (HIDDEN, W_NUMEL), dtype=jnp.float32)
    denom = jnp.array([2.0], dtype=jnp.float32)                                 # denominator parameter

    out = irreps_convolution(x, edge_attr, edge_embed, edge_index, w1, w2, denom)
    out = jax.block_until_ready(out)

    ref = reference(x, edge_attr, edge_embed, edge_index, w1, w2, denom)
    if not np.allclose(np.asarray(out), np.asarray(ref), rtol=1e-4, atol=1e-4):
        raise AssertionError("Pallas kernel does not match reference")
    print("KERNEL_OK")
</pallas_src>

<mosaic_0001>
module attributes {stable_mosaic.version = 11 : i64} {
  func.func @irreps_conv_kernel(%arg0: i32, %arg1: memref<1x16xi32, #tpu.memory_space<vmem>>, %arg2: memref<16x1xi32, #tpu.memory_space<vmem>>, %arg3: memref<8x16xf32, #tpu.memory_space<vmem>>, %arg4: memref<16x4xf32, #tpu.memory_space<vmem>>, %arg5: memref<16x8xf32, #tpu.memory_space<vmem>>, %arg6: memref<8x16xf32, #tpu.memory_space<vmem>>, %arg7: memref<16x16xf32, #tpu.memory_space<vmem>>, %arg8: memref<16x40xf32, #tpu.memory_space<vmem>>, %arg9: memref<4x40xf32, #tpu.memory_space<vmem>>, %arg10: memref<16x40xf32, #tpu.memory_space<vmem>>, %arg11: memref<40x32xf32, #tpu.memory_space<vmem>>, %arg12: memref<1x1xf32, #tpu.memory_space<vmem>>, %arg13: memref<8x32xf32, #tpu.memory_space<vmem>>) attributes {dimension_semantics = [#tpu.dimension_semantics<arbitrary>], iteration_bounds = array<i64: 1>, scalar_prefetch = 0 : i64, scratch_operands = 0 : i64, tpu.core_type = #tpu.core_type<tc>, window_params = [{pipeline_mode = #tpu.pipeline_mode<synchronous>, transform_indices = @transform_0, window_bounds = array<i64: 1, 16>}, {pipeline_mode = #tpu.pipeline_mode<synchronous>, transform_indices = @transform_1, window_bounds = array<i64: 16, 1>}, {pipeline_mode = #tpu.pipeline_mode<synchronous>, transform_indices = @transform_2, window_bounds = array<i64: 8, 16>}, {pipeline_mode = #tpu.pipeline_mode<synchronous>, transform_indices = @transform_3, window_bounds = array<i64: 16, 4>}, {pipeline_mode = #tpu.pipeline_mode<synchronous>, transform_indices = @transform_4, window_bounds = array<i64: 16, 8>}, {pipeline_mode = #tpu.pipeline_mode<synchronous>, transform_indices = @transform_5, window_bounds = array<i64: 8, 16>}, {pipeline_mode = #tpu.pipeline_mode<synchronous>, transform_indices = @transform_6, window_bounds = array<i64: 16, 16>}, {pipeline_mode = #tpu.pipeline_mode<synchronous>, transform_indices = @transform_7, window_bounds = array<i64: 16, 40>}, {pipeline_mode = #tpu.pipeline_mode<synchronous>, transform_indices = @transform_8, window_bounds = array<i64: 4, 40>}, {pipeline_mode = #tpu.pipeline_mode<synchronous>, transform_indices = @transform_9, window_bounds = array<i64: 16, 40>}, {pipeline_mode = #tpu.pipeline_mode<synchronous>, transform_indices = @transform_10, window_bounds = array<i64: 40, 32>}, {pipeline_mode = #tpu.pipeline_mode<synchronous>, transform_indices = @transform_11, window_bounds = array<i64: 1, 1>}, {pipeline_mode = #tpu.pipeline_mode<synchronous>, transform_indices = @transform_12, window_bounds = array<i64: 8, 32>}]} {
    %c0 = arith.constant 0 : index
    %c0_0 = arith.constant 0 : index
    %0 = vector.load %arg6[%c0, %c0_0] : memref<8x16xf32, #tpu.memory_space<vmem>>, vector<8x16xf32>
    %cst = arith.constant 0.353553385 : f32
    %1 = vector.broadcast %cst : f32 to vector<8x16xf32>
    %2 = arith.mulf %0, %1 : vector<8x16xf32>
    %c0_1 = arith.constant 0 : index
    %c0_2 = arith.constant 0 : index
    %3 = vector.load %arg7[%c0_1, %c0_2] : memref<16x16xf32, #tpu.memory_space<vmem>>, vector<16x16xf32>
    %cst_3 = arith.constant 0.468899071 : f32
    %4 = vector.broadcast %cst_3 : f32 to vector<16x16xf32>
    %5 = arith.mulf %3, %4 : vector<16x16xf32>
    %c0_4 = arith.constant 0 : index
    %c0_5 = arith.constant 0 : index
    %6 = vector.load %arg5[%c0_4, %c0_5] : memref<16x8xf32, #tpu.memory_space<vmem>>, vector<16x8xf32>
    %cst_6 = arith.constant dense<0.000000e+00> : vector<16x16xf32>
    %7 = tpu.matmul %6, %2, %cst_6 {dimension_numbers = #tpu.dot_dimension_numbers<[1], [0], [0], [1], [0, 0, 1, 1], [], []>} : vector<16x8xf32>, vector<8x16xf32>, vector<16x16xf32> -> vector<16x16xf32>
    %cst_7 = arith.constant 0.000000e+00 : f32
    %8 = vector.broadcast %cst_7 : f32 to vector<16x16xf32>
    %9 = arith.maximumf %7, %8 : vector<16x16xf32>
    %10 = math.absf %7 : vector<16x16xf32>
    %cst_8 = arith.constant 0.000000e+00 : f32
    %11 = vector.broadcast %cst_8 : f32 to vector<16x16xf32>
    %12 = arith.subf %11, %10 : vector<16x16xf32>
    %13 = math.exp %12 : vector<16x16xf32>
    %14 = math.log1p %13 : vector<16x16xf32>
    %15 = arith.addf %9, %14 : vector<16x16xf32>
    %cst_9 = arith.constant 0.693147182 : f32
    %16 = vector.broadcast %cst_9 : f32 to vector<16x16xf32>
    %17 = arith.subf %15, %16 : vector<16x16xf32>
    %cst_10 = arith.constant dense<0.000000e+00> : vector<16x16xf32>
    %18 = tpu.matmul %17, %5, %cst_10 {dimension_numbers = #tpu.dot_dimension_numbers<[1], [0], [0], [1], [0, 0, 1, 1], [], []>} : vector<16x16xf32>, vector<16x16xf32>, vector<16x16xf32> -> vector<16x16xf32>
    %c0_11 = arith.constant 0 : index
    %c0_12 = arith.constant 0 : index
    %19 = vector.load %arg3[%c0_11, %c0_12] : memref<8x16xf32, #tpu.memory_space<vmem>>, vector<8x16xf32>
    %c0_13 = arith.constant 0 : index
    %c0_14 = arith.constant 0 : index
    %20 = vector.load %arg8[%c0_13, %c0_14] : memref<16x40xf32, #tpu.memory_space<vmem>>, vector<16x40xf32>
    %cst_15 = arith.constant dense<0.000000e+00> : vector<8x40xf32>
    %21 = tpu.matmul %19, %20, %cst_15 {dimension_numbers = #tpu.dot_dimension_numbers<[1], [0], [0], [1], [0, 0, 1, 1], [], []>} : vector<8x16xf32>, vector<16x40xf32>, vector<8x40xf32> -> vector<8x40xf32>
    %22 = tpu.iota {dimensions = array<i32: 1>} : vector<16x8xi32>
    %c0_16 = arith.constant 0 : index
    %c0_17 = arith.constant 0 : index
    %23 = vector.load %arg2[%c0_16, %c0_17] : memref<16x1xi32, #tpu.memory_space<vmem>>, vector<16x1xi32>
    %24 = vector.broadcast %23 : vector<16x1xi32> to vector<16x8xi32>
    %25 = arith.cmpi eq, %22, %24 : vector<16x8xi32>
    %26 = arith.extui %25 : vector<16x8xi1> to vector<16x8xi32>
    %27 = arith.sitofp %26 : vector<16x8xi32> to vector<16x8xf32>
    %cst_18 = arith.constant dense<0.000000e+00> : vector<16x40xf32>
    %28 = tpu.matmul %27, %21, %cst_18 {dimension_numbers = #tpu.dot_dimension_numbers<[1], [0], [0], [1], [0, 0, 1, 1], [], []>} : vector<16x8xf32>, vector<8x40xf32>, vector<16x40xf32> -> vector<16x40xf32>
    %c0_19 = arith.constant 0 : index
    %c0_20 = arith.constant 0 : index
    %29 = vector.load %arg4[%c0_19, %c0_20] : memref<16x4xf32, #tpu.memory_space<vmem>>, vector<16x4xf32>
    %c0_21 = arith.constant 0 : index
    %c0_22 = arith.constant 0 : index
    %30 = vector.load %arg9[%c0_21, %c0_22] : memref<4x40xf32, #tpu.memory_space<vmem>>, vector<4x40xf32>
    %cst_23 = arith.constant dense<0.000000e+00> : vector<16x40xf32>
    %31 = tpu.matmul %29, %30, %cst_23 {dimension_numbers = #tpu.dot_dimension_numbers<[1], [0], [0], [1], [0, 0, 1, 1], [], []>} : vector<16x4xf32>, vector<4x40xf32>, vector<16x40xf32> -> vector<16x40xf32>
    %c0_24 = arith.constant 0 : index
    %c0_25 = arith.constant 0 : index
    %32 = vector.load %arg10[%c0_24, %c0_25] : memref<16x40xf32, #tpu.memory_space<vmem>>, vector<16x40xf32>
    %cst_26 = arith.constant dense<0.000000e+00> : vector<16x40xf32>
    %33 = tpu.matmul %18, %32, %cst_26 {dimension_numbers = #tpu.dot_dimension_numbers<[1], [0], [0], [1], [0, 0, 1, 1], [], []>} : vector<16x16xf32>, vector<16x40xf32>, vector<16x40xf32> -> vector<16x40xf32>
    %34 = arith.mulf %28, %31 : vector<16x40xf32>
    %35 = arith.mulf %34, %33 : vector<16x40xf32>
    %c0_27 = arith.constant 0 : index
    %c0_28 = arith.constant 0 : index
    %36 = vector.load %arg12[%c0_27, %c0_28] : memref<1x1xf32, #tpu.memory_space<vmem>>, vector<1x1xf32>
    %cst_29 = arith.constant 1.000000e+00 : f32
    %37 = vector.broadcast %cst_29 : f32 to vector<1x1xf32>
    %38 = arith.divf %37, %36 : vector<1x1xf32>
    %39 = tpu.iota {dimensions = array<i32: 0>} : vector<8x16xi32>
    %c0_30 = arith.constant 0 : index
    %c0_31 = arith.constant 0 : index
    %40 = vector.load %arg1[%c0_30, %c0_31] : memref<1x16xi32, #tpu.memory_space<vmem>>, vector<1x16xi32>
    %41 = vector.broadcast %40 : vector<1x16xi32> to vector<8x16xi32>
    %42 = arith.cmpi eq, %39, %41 : vector<8x16xi32>
    %cst_32 = arith.constant 0.000000e+00 : f32
    %43 = vector.shape_cast %38 : vector<1x1xf32> to vector<1x1xf32>
    %44 = vector.broadcast %43 : vector<1x1xf32> to vector<8x16xf32>
    %45 = vector.broadcast %cst_32 : f32 to vector<8x16xf32>
    %46 = arith.select %42, %44, %45 : vector<8x16xi1>, vector<8x16xf32>
    %cst_33 = arith.constant dense<0.000000e+00> : vector<8x40xf32>
    %47 = tpu.matmul %46, %35, %cst_33 {dimension_numbers = #tpu.dot_dimension_numbers<[1], [0], [0], [1], [0, 0, 1, 1], [], []>} : vector<8x16xf32>, vector<16x40xf32>, vector<8x40xf32> -> vector<8x40xf32>
    %c0_34 = arith.constant 0 : index
    %c0_35 = arith.constant 0 : index
    %48 = vector.load %arg11[%c0_34, %c0_35] : memref<40x32xf32, #tpu.memory_space<vmem>>, vector<40x32xf32>
    %cst_36 = arith.constant dense<0.000000e+00> : vector<8x32xf32>
    %49 = tpu.matmul %47, %48, %cst_36 {dimension_numbers = #tpu.dot_dimension_numbers<[1], [0], [0], [1], [0, 0, 1, 1], [], []>} : vector<8x40xf32>, vector<40x32xf32>, vector<8x32xf32> -> vector<8x32xf32>
    %c0_37 = arith.constant 0 : index
    %c0_38 = arith.constant 0 : index
    %50 = vector.load %arg13[%c0_37, %c0_38] : memref<8x32xf32, #tpu.memory_space<vmem>>, vector<8x32xf32>
    tpu.vector_store %arg13[%c0_37, %c0_38], %49 {strides = array<i32>} : memref<8x32xf32, #tpu.memory_space<vmem>>, vector<8x32xf32>,
    return
  }
  func.func @transform_0(%arg0: i32) -> (i32, i32) {
    %c0_i32 = arith.constant 0 : i32
    %c0_i32_0 = arith.constant 0 : i32
    %c0_i32_1 = arith.constant 0 : i32
    return %c0_i32, %c0_i32_0 : i32, i32
  }
  func.func @transform_1(%arg0: i32) -> (i32, i32) {
    %c0_i32 = arith.constant 0 : i32
    %c0_i32_0 = arith.constant 0 : i32
    %c0_i32_1 = arith.constant 0 : i32
    return %c0_i32, %c0_i32_0 : i32, i32
  }
  func.func @transform_2(%arg0: i32) -> (i32, i32) {
    %c0_i32 = arith.constant 0 : i32
    %c0_i32_0 = arith.constant 0 : i32
    %c0_i32_1 = arith.constant 0 : i32
    return %c0_i32, %c0_i32_0 : i32, i32
  }
  func.func @transform_3(%arg0: i32) -> (i32, i32) {
    %c0_i32 = arith.constant 0 : i32
    %c0_i32_0 = arith.constant 0 : i32
    %c0_i32_1 = arith.constant 0 : i32
    return %c0_i32, %c0_i32_0 : i32, i32
  }
  func.func @transform_4(%arg0: i32) -> (i32, i32) {
    %c0_i32 = arith.constant 0 : i32
    %c0_i32_0 = arith.constant 0 : i32
    %c0_i32_1 = arith.constant 0 : i32
    return %c0_i32, %c0_i32_0 : i32, i32
  }
  func.func @transform_5(%arg0: i32) -> (i32, i32) {
    %c0_i32 = arith.constant 0 : i32
    %c0_i32_0 = arith.constant 0 : i32
    %c0_i32_1 = arith.constant 0 : i32
    return %c0_i32, %c0_i32_0 : i32, i32
  }
  func.func @transform_6(%arg0: i32) -> (i32, i32) {
    %c0_i32 = arith.constant 0 : i32
    %c0_i32_0 = arith.constant 0 : i32
    %c0_i32_1 = arith.constant 0 : i32
    return %c0_i32, %c0_i32_0 : i32, i32
  }
  func.func @transform_7(%arg0: i32) -> (i32, i32) {
    %c0_i32 = arith.constant 0 : i32
    %c0_i32_0 = arith.constant 0 : i32
    %c0_i32_1 = arith.constant 0 : i32
    return %c0_i32, %c0_i32_0 : i32, i32
  }
  func.func @transform_8(%arg0: i32) -> (i32, i32) {
    %c0_i32 = arith.constant 0 : i32
    %c0_i32_0 = arith.constant 0 : i32
    %c0_i32_1 = arith.constant 0 : i32
    return %c0_i32, %c0_i32_0 : i32, i32
  }
  func.func @transform_9(%arg0: i32) -> (i32, i32) {
    %c0_i32 = arith.constant 0 : i32
    %c0_i32_0 = arith.constant 0 : i32
    %c0_i32_1 = arith.constant 0 : i32
    return %c0_i32, %c0_i32_0 : i32, i32
  }
  func.func @transform_10(%arg0: i32) -> (i32, i32) {
    %c0_i32 = arith.constant 0 : i32
    %c0_i32_0 = arith.constant 0 : i32
    %c0_i32_1 = arith.constant 0 : i32
    return %c0_i32, %c0_i32_0 : i32, i32
  }
  func.func @transform_11(%arg0: i32) -> (i32, i32) {
    %c0_i32 = arith.constant 0 : i32
    %c0_i32_0 = arith.constant 0 : i32
    %c0_i32_1 = arith.constant 0 : i32
    return %c0_i32, %c0_i32_0 : i32, i32
  }
  func.func @transform_12(%arg0: i32) -> (i32, i32) {
    %c0_i32 = arith.constant 0 : i32
    %c0_i32_0 = arith.constant 0 : i32
    %c0_i32_1 = arith.constant 0 : i32
    return %c0_i32, %c0_i32_0 : i32, i32
  }
}

</mosaic_0001>

<bundles_post_ra>
// kernel: tpu_custom_call.1
= control target key start
LH: loop header
LB: loop body
LE: loop exit
PB: predicated region body
PF: predicated region fallthrough
CT: control target
= control target key end

     0   :  { %s1093_s0 = inlined_call_operand.vmem [shape: s32[1,16], index: 0, kind: input, shape index: {}]   ;;  %s1094_s1 = inlined_call_operand.vmem [shape: s32[16,1], index: 1, kind: input, shape index: {}]   ;;  %s1095_s2 = inlined_call_operand.vmem [shape: f32[8,16], index: 2, kind: input, shape index: {}]   ;;  %s1096_s3 = inlined_call_operand.vmem [shape: f32[16,4], index: 3, kind: input, shape index: {}]   ;;  %s1097_s4 = inlined_call_operand.vmem [shape: f32[16,8], index: 4, kind: input, shape index: {}]   ;;  %s1098_s5 = inlined_call_operand.vmem [shape: f32[8,16], index: 5, kind: input, shape index: {}]   ;;  %s1099_s6 = inlined_call_operand.vmem [shape: f32[16,16], index: 6, kind: input, shape index: {}]   ;;  %s1100_s7 = inlined_call_operand.vmem [shape: f32[16,40], index: 7, kind: input, shape index: {}]   ;;  %s1101_s8 = inlined_call_operand.vmem [shape: f32[4,40], index: 8, kind: input, shape index: {}]   ;;  %s1102_s9 = inlined_call_operand.vmem [shape: f32[16,40], index: 9, kind: input, shape index: {}]   ;;  %s1103_s10 = inlined_call_operand.vmem [shape: f32[40,32], index: 10, kind: input, shape index: {}]   ;;  %s1104_s11 = inlined_call_operand.<no memory space> [shape: f32[1,1], index: 11, kind: input, shape index: {}]   ;;  %s1105_s12 = inlined_call_operand.hbm [shape: f32[8,32], index: 12, kind: output, shape index: {}]  }
   0x1   :  { %v17_v0 = vstv %s1104_s11 }
   0x2   :  { %18 = vst [vmem:[#allocation2] sm:$0x1] %v17_v0 }
   0x3   :  { %v44_v1 = vld [vmem:[%s1098_s5] sm:$0xff]  ;;  %vm52_vm0 = vcmask 64512  }
   0x4   :  { %v50_v2 = vld [vmem:[%s1097_s4] sm:$0xff]  ;;  %v45_v3 = vmul.f32 0.35355338, %v44_v1 }
   0x5   :  { %836 = vmatprep.mubr.msk.f32.mxu0 %vm52_vm0, %v50_v2 }
   0x6   :  { %19 = vsyncpa [#allocation4], 0  ;;  %v51_v4 = vld [vmem:[%s1097_s4 + $0x8] sm:$0xff]  ;;  %834 = vmatprep.subr.mxu0 %v45_v3  ;;  %v46_v7 = vld [vmem:[%s1099_s6] sm:$0xff]  ;;  %v928_v9 = vmov 0.0   ;;  %v929_v11 = vmov 0   ;;  %v324_v48 = vlaneseq }
   0x7   :  { %835 = vmatpush3.msra.mxu0 %v45_v3  ;;  %v47_v5 = vld [vmem:[%s1099_s6 + $0x8] sm:$0xff]  ;;  %v48_v8 = vmul.f32 0.46889907, %v46_v7  ;;  %v326_v10 = vld [vmem:[%s1094_s1] sm:$0xff]  ;;  %894 = vset.pattern.permute.xlu0 %v929_v11  ;;  %vm166_vm3 = vcmask 130048   ;;  %vm930_vm4 = vmmov 0  }
   0x8   :  { %837 = vmatmul.mubr.msk.f32.vlgmr.msra.gmra.mxu0 %vm52_vm0, %v51_v4  ;;  %v49_v6 = vmul.f32 0.46889907, %v47_v5  ;;  %895 = vset.pattern.permute.xlu1 %v929_v11  ;;  %v327_v12 = vld [vmem:[%s1094_s1 + $0x8] sm:$0xff]  ;;  %v249_v46 = vld [vmem:[%s1100_s7] sm:$0xff]  ;;  %v325_v49 = vand.u32 127, %v324_v48  ;;  %vm431_vm6 = vcmask 1043456  }
   0x9   :  { %329 = vperm.xlu0 %894, %v326_v10   ;;  %v250_v45 = vld [vmem:[%s1100_s7 + $0x8] sm:$0xff]  ;;  %v248_v47 = vld [vmem:[%s1095_s2] sm:$0xff]  ;;  %vm424_vm7 = vcmask 31744   ;;  %v601_v56 = vshrl.u32 %v324_v48, 7  ;;  %v694_v5 = vld [vmem:[%s1103_s10 + $0x18] sm:$0xff]  ;;  %vm696_vm10 = vcmask 326656  }
   0xa   :  { %839 = vmatprep.subr.mxu0 %v49_v6  ;;  %v423_v52 = vld [vmem:[%s1101_s8] sm:$0xf]  ;;  %v422_v54 = vld [vmem:[%s1096_s3 + $0x8] sm:$0xff]  ;;  %vm770_vm11 = vcmask 261120  }
   0xb   :  { %840 = vmatpush3.msra.mxu0 %v49_v6  ;;  %v421_v53 = vld [vmem:[%s1096_s3] sm:$0xff]  ;;  %v611_v57 = vsub.s32 0, %v601_v56  ;;  %v511_v0 = vld [vmem:[%s1102_s9 + $0x8] sm:$0xff]  ;;  %v693_v6 = vld [vmem:[%s1103_s10 + $0x10] sm:$0xff] }
   0xc   :  { %841 = vmatprep.subr.mxu0 %v48_v8  ;;  %v597_v55 = vld [vmem:[#allocation2] sm:$0x1]  ;;  %v692_v7 = vld [vmem:[%s1103_s10 + $0x8] sm:$0xff] }
   0xd   :  { %842 = vmatpush3.msra.mxu0 %v48_v8  ;;  %332 = vperm.xlu0 %894, %v327_v12   ;;  %v510_v3 = vld [vmem:[%s1102_s9] sm:$0xff] }
   0xe   :  { %846 = vmatprep.subr.mxu0 %v928_v9  ;;  %v695_v4 = vld [vmem:[%s1103_s10 + $0x20] sm:$0xff] }
   0xf   :  { %v802_v11 = vld [vmem:[%s1093_s0] ss:$0 sm:$0xff]  ;;  %s931_s0 = smov [#allocation3]  }
  0x10   :  { %vm607_vm9 = vcmp.eq.s32.totalorder %v601_v56, %v802_v11  ;;  %s778_s1 = sshll.u32 %s931_s0, 4  ;;  %s779_s1 = int_to_ptr.vmem [resolvable:$true] %s778_s1 }
  0x11   :  { %s906_s6 = scalar_lea.vmem %s779_s1, 128  ;;  %p911_p1 = scmp.lt.s32.totalorder %s779_s1, %s779_s1 }
  0x12   :  { %p907_p0 = scmp.ne.s32.totalorder %s779_s1, %s906_s6  ;;  %p912_p2 = scmp.lt.s32.totalorder %s906_s6, %s906_s6 }
  0x14   :  { %p913_p3 = por %p912_p2, %p911_p1 }
  0x16   :  { %p914_p4 = pnand %p913_p3, %p907_p0 }
  0x84   :  { %v330_v50 = vpop.permute.xlu0 %329 }
  0x85   :  { %vm334_vm5 = vcmp.eq.s32.totalorder %v325_v49, %v330_v50 }
  0x86   :  { %v793_v51 = vsel %vm334_vm5, 1.0, %v928_v9 }
  0x87   :  { %855 = vmatprep.mubr.msk.f32.mxu1 %vm52_vm0, %v793_v51 }
  0x88   :  { %v333_v60 = vpop.permute.xlu0 %332 }
  0x89   :  { %vm335_vm8 = vcmp.eq.s32.totalorder %v325_v49, %v333_v60 }
  0x8a   :  { %v794_v1 = vsel %vm335_vm8, 1.0, %v928_v9 }
  0xc8   :  { %v838_v13 = vpop.f32.mrf.mxu0 }
  0xc9   :  { %v137_v14 = vand.u32 2147483647, %v838_v13  ;;  %v135_v35 = vmax.f32 %v838_v13, 0.0 }
  0xca   :  { %v125_v15 = vpop.f32.mrf.mxu0 }
  0xcb   :  { %v139_v16 = vsub.f32 0.0, %v137_v14  ;;  %v136_v17 = vand.u32 2147483647, %v125_v15  ;;  %v134_v39 = vmax.f32 %v125_v15, 0.0 }
  0xcd   :  { %v142_v18 = vmul.f32 1.442695, %v139_v16  ;;  %v138_v19 = vsub.f32 0.0, %v136_v17 }
  0xcf   :  { %896 = vpow2.f32 %v142_v18  ;;  %v140_v20 = vmul.f32 1.442695, %v138_v19 }
  0xd1   :  { %898 = vpow2.f32 %v140_v20 }
  0xdc   :  { %v897_v21 = vpop.eup %896 }
  0xdd   :  { %v153_v22 = vadd.f32 1.0, %v897_v21  ;;  %v156_v25 = vmul.f32 -0.5, %v897_v21  ;;  %v159_v28 = vand.u32 2147483647, %v897_v21 }
  0xde   :  { %v899_v23 = vpop.eup %898 }
  0xdf   :  { %900 = vlog2.f32 %v153_v22  ;;  %v144_v24 = vadd.f32 1.0, %v899_v23  ;;  %v147_v26 = vmul.f32 -0.5, %v899_v23  ;;  %v157_v27 = vadd.f32 1.0, %v156_v25  ;;  %v691_v22 = vld [vmem:[%s1103_s10] sm:$0xff] }
  0xe0   :  { %v150_v31 = vand.u32 2147483647, %v899_v23  ;;  %vm160_vm1 = vcmp.lt.f32.partialorder %v159_v28, 0.0004427343 }
  0xe1   :  { %902 = vlog2.f32 %v144_v24  ;;  %v148_v29 = vadd.f32 1.0, %v147_v26  ;;  %v158_v33 = vmul.f32 %v897_v21, %v157_v27 }
  0xe2   :  { %vm151_vm2 = vcmp.lt.f32.partialorder %v150_v31, 0.0004427343  ;;  %904 = vrcp.f32 %v597_v55 }
  0xe3   :  { %v149_v38 = vmul.f32 %v899_v23, %v148_v29 }
  0xec   :  { %v901_v30 = vpop.eup %900 }
  0xed   :  { %v155_v32 = vmul.f32 0.6931472, %v901_v30 }
  0xee   :  { %v903_v34 = vpop.eup %902 }
  0xef   :  { %v161_v36 = vsel %vm160_vm1, %v158_v33, %v155_v32  ;;  %v146_v37 = vmul.f32 0.6931472, %v903_v34  ;;  %v905_v58 = vpop.eup %904 }
  0xf0   :  { %v163_v40 = vadd.f32 %v161_v36, %v135_v35  ;;  %v612_v59 = vrot.slane %v905_v58, %v611_v57 }
  0xf1   :  { %v152_v41 = vsel %vm151_vm2, %v149_v38, %v146_v37 }
  0xf2   :  { %v162_v42 = vadd.f32 %v152_v41, %v134_v39  ;;  %v789_v44 = vadd.f32 -0.6931472, %v163_v40  ;;  %614 = vperm.xlu1 %895, %v612_v59  }
  0xf4   :  { %v788_v43 = vadd.f32 -0.6931472, %v162_v42 }
  0xf6   :  { %843 = vmatprep.mubr.msk.f32.mxu0 %vm166_vm3, %v788_v43 }
  0xf7   :  { %844 = vmatmul.mubr.msk.f32.vlgmr.msra.gmra.mxu0 %vm166_vm3, %v789_v44 }
  0xf8   :  { %847 = vmatpush3.msra.mxu0 %v250_v45  ;;  %850 = vmatprep.mubr.msk.f32.mxu0 %vm930_vm4, %v928_v9 }
  0xf9   :  { %848 = vmatprep.subr.mxu0 %v928_v9 }
  0xfa   :  { %849 = vmatpush3.msra.mxu0 %v249_v46 }
  0xfb   :  { %851 = vmatmul.mubr.msk.f32.vlgmr.msra.gmra.mxu0 %vm166_vm3, %v248_v47  ;;  %858 = vmatprep.subr.msk.mxu0 %vm431_vm6, %v423_v52 }
  0xfc   :  { %859 = vmatpush3.msk.msra.mxu0 %vm431_vm6, %v423_v52  ;;  %860 = vmatprep.mubr.msk.f32.mxu0 %vm424_vm7, %v421_v53 }
  0xfd   :  { %870 = vmatprep.subr.mxu0 %v928_v9 }
  0xff   :  { %861 = vmatmul.mubr.msk.f32.vlgmr.msra.gmra.mxu0 %vm424_vm7, %v422_v54 }
 0x100   :  { %874 = vmatprep.mubr.msk.f32.mxu0 %vm930_vm4, %v928_v9 }
 0x16d   :  { %v615_v16 = vpop.permute.xlu1 %614 }
 0x16e   :  { %v617_v21 = vsel %vm607_vm9, %v615_v16, 0.0 }
 0x1b7   :  { %v845_v61 = vpop.f32.mrf.mxu0 }
 0x1b9   :  { %v239_v62 = vpop.f32.mrf.mxu0 }
 0x1bb   :  { %v320_v63 = vpop.f32.mrf.mxu0 }
 0x1bc   :  { %853 = vmatprep.subr.mxu1 %v320_v63 }
 0x1bd   :  { %v852_v2 = vpop.f32.mrf.mxu0  ;;  %854 = vmatpush3.msra.mxu1 %v320_v63 }
 0x1be   :  { %856 = vmatmul.mubr.msk.f32.vlgmr.msra.gmra.mxu1 %vm52_vm0, %v794_v1  ;;  %863 = vmatprep.subr.mxu1 %v511_v0 }
 0x1bf   :  { %864 = vmatpush3.msra.mxu1 %v511_v0  ;;  %867 = vmatprep.mubr.msk.f32.mxu1 %vm166_vm3, %v239_v62  ;;  %v862_v8 = vpop.f32.mrf.mxu0 }
 0x1c0   :  { %865 = vmatprep.subr.mxu1 %v510_v3 }
 0x1c1   :  { %866 = vmatpush3.msra.mxu1 %v510_v3  ;;  %v501_v13 = vpop.f32.mrf.mxu0 }
 0x1c2   :  { %868 = vmatmul.mubr.msk.f32.vlgmr.msra.gmra.mxu1 %vm166_vm3, %v845_v61  ;;  %877 = vmatprep.subr.mxu1 %v928_v9 }
 0x1c3   :  { %887 = vmatprep.mubr.msk.f32.mxu1 %vm930_vm4, %v928_v9  ;;  %878 = vmatpush3.msra.mxu1 %v695_v4 }
 0x1c4   :  { %879 = vmatprep.subr.mxu1 %v928_v9 }
 0x1c5   :  { %880 = vmatpush3.msra.mxu1 %v694_v5 }
 0x1c6   :  { %881 = vmatprep.subr.mxu1 %v928_v9 }
 0x1c7   :  { %882 = vmatpush3.msra.mxu1 %v693_v6 }
 0x1c8   :  { %883 = vmatprep.subr.mxu1 %v928_v9 }
 0x1c9   :  { %884 = vmatpush3.msra.mxu1 %v692_v7 }
 0x1ca   :  { %885 = vmatprep.subr.mxu1 %v928_v9 }
 0x1cb   :  { %886 = vmatpush3.msra.mxu1 %v691_v22 }
 0x27e   :  { %v857_v10 = vpop.f32.mrf.mxu1 }
 0x27f   :  { %v594_v14 = vmul.f32 %v862_v8, %v857_v10 }
 0x280   :  { %v412_v12 = vpop.f32.mrf.mxu1 }
 0x281   :  { %v593_v17 = vmul.f32 %v501_v13, %v412_v12 }
 0x282   :  { %v869_v15 = vpop.f32.mrf.mxu1 }
 0x283   :  { %v596_v18 = vmul.f32 %v869_v15, %v594_v14 }
 0x284   :  { %v584_v19 = vpop.f32.mrf.mxu1 }
 0x285   :  { %v595_v20 = vmul.f32 %v593_v17, %v584_v19  ;;  %871 = vmatpush3.msra.mxu0 %v596_v18 }
 0x286   :  { %872 = vmatprep.subr.mxu0 %v928_v9 }
 0x287   :  { %873 = vmatpush3.msra.mxu0 %v595_v20 }
 0x288   :  { %875 = vmatmul.mubr.msk.f32.vlgmr.msra.gmra.mxu0 %vm166_vm3, %v617_v21 }
 0x348   :  { %v687_v23 = vpop.f32.mrf.mxu0 }
 0x349   :  { %888 = vmatmul.mubr.msk.f32.vlgmr.msra.gmra.mxu1 %vm696_vm10, %v687_v23 }
 0x34a   :  { %v876_v24 = vpop.f32.mrf.mxu0 }
 0x409   :  { %v766_v25 = vpop.f32.mrf.mxu1 }
 0x40a   :  { %771 = vst.msk [vmem:[#allocation3] sm:$0xff] %vm770_vm11, %v766_v25 }
 0x40b   :  { %v889_v26 = vpop.f32.mrf.mxu1 }
 0x40c   :  { %917 = shalt.err (!%p914_p4)
}
 0x40d   :  { %781 = dma.vmem_to_hbm [thread:$0]  %s779_s1, 128, %s1105_s12, [#allocation4]  }
 0x40e   :  { %926 = dma.done.wait [#allocation4], 128  }
 0x40f   :  { %927 = vsyncadd [#allocation4], 4294967168 }
 0x410   :  { %785 = vsyncpa [#allocation4], 1 }

</bundles_post_ra>
